<compile_context>
chip_gen: v7x
topology: tpu7x:2x2x1
jax: 0.10.0
libtpu: 0.0.40
codegen_flags: <defaults>
</compile_context>

<pallas_src>
import jax
import jax.numpy as jnp
from jax import lax
from jax.experimental import pallas as pl
from jax.experimental.pallas import tpu as pltpu


def _round_up(x, m):
    return (x + m - 1) // m * m


def _cdiv(a, b):
    return -(-a // b)


def _arch_defaults():
    """(max batch tile, vmem_limit cap) tuned per TPU generation."""
    try:
        kind = jax.devices()[0].device_kind.lower()
    except Exception:  # pragma: no cover
        kind = ""
    if ("v5" in kind) or ("v6" in kind):
        return 512, 64 << 20      # 128 MiB VMEM/core: bigger tiles are free
    return 256, 48 << 20          # v7x (64 MiB VMEM/core) / unknown: conservative


def pad_embedding_table(table):
    """One-time prep (hoisted out of the forward path): zero-pad the table to
    (round_up(n_classes,128), round_up(embed_dim,128)). Do this at module init,
    not per call, so forward never re-copies the table in HBM."""
    n_classes, embed_dim = table.shape
    n_p = _round_up(n_classes, 128)
    d_p = _round_up(embed_dim, 128)
    if (n_p, d_p) != (n_classes, embed_dim):
        table = jnp.pad(table, ((0, n_p - n_classes), (0, d_p - embed_dim)))
    return table


def _class_embed_kernel(idx_ref, table_ref, o_ref, iota_ref):
    # idx_ref:   (TB, 1) int32 class ids for this batch tile
    # table_ref: (n_classes_p, embed_dim_p) VMEM-resident embedding table
    # o_ref:     (TB, embed_dim_p) output tile
    # iota_ref:  (TB, n_classes_p) int32 scratch: cached class-index iota
    @pl.when(pl.program_id(1) == 0)
    def _():
        # Filled once per core on the first sequential step, reused afterwards.
        iota_ref[...] = lax.broadcasted_iota(jnp.int32, iota_ref.shape, 1)

    one_hot = (idx_ref[...] == iota_ref[...]).astype(table_ref.dtype)
    # Gather as a one-hot matmul on the MXU (exact row selection).
    o_ref[...] = jnp.dot(
        one_hot, table_ref[...], preferred_element_type=jnp.float32
    ).astype(o_ref.dtype)


def class_embed_lookup(class_ids, table_padded, n_classes, embed_dim, *, max_tb=None):
    """class_ids: (B,) ints; table_padded: output of pad_embedding_table.
    Returns (B, embed_dim) gathered rows (original, un-padded embed_dim)."""
    (B,) = class_ids.shape
    n_classes_p, embed_dim_p = table_padded.shape
    arch_tb, vmem_cap = _arch_defaults()
    if max_tb is None:
        max_tb = arch_tb

    # PyTorch hands int64 labels; cast to int32 and clamp so an out-of-range id
    # can never address the wrong / out-of-bounds table row.
    # TODO(synk): nn.Embedding raises on out-of-range ids; clamping silently
    # remaps them — add a host-side check if bad labels must be caught.
    idx = jnp.clip(class_ids.astype(jnp.int32), 0, n_classes - 1)

    itemsize = jnp.dtype(table_padded.dtype).itemsize
    table_bytes = n_classes_p * embed_dim_p * itemsize

    # Batch tile: multiple of 8 sublanes, big enough to amortize the ~0.35 µs
    # per-grid-step overhead, capped per generation.
    TB = min(_round_up(B, 8), _round_up(max_tb, 8))
    n_tiles = _cdiv(B, TB)

    # 2-way parallel split (v7x has 2 TensorCores): only when the batch is big
    # enough that duplicating the table DMA on the second core is amortized.
    out_bytes = B * embed_dim_p * itemsize
    g0 = 2 if (n_tiles >= 2 and out_bytes > table_bytes) else 1
    g1 = _cdiv(n_tiles, g0)
    b_total = g0 * g1 * TB
    if b_total != B:
        idx = jnp.pad(idx, (0, b_total - B))   # pad rows gather class 0, sliced off
    idx2d = idx.reshape(b_total, 1)

    # VMEM budget: table (single-buffered) + double-buffered idx/out tiles +
    # iota scratch + one-hot & f32 matmul staging; 2x margin, per-gen cap.
    tile_bytes = (
        2 * TB * 128 * 4                      # idx tiles (lane-padded), 2 buffers
        + 2 * TB * embed_dim_p * itemsize     # output tiles, 2 buffers
        + TB * n_classes_p * 4                # iota scratch
        + TB * n_classes_p * itemsize         # one-hot intermediate
        + TB * embed_dim_p * 4                # f32 matmul result staging
    )
    vmem_limit = int(min(max(2 * (table_bytes + tile_bytes), 16 << 20), vmem_cap))
    # TODO(synk): tables too large for VMEM residency need a scalar-prefetch
    # row-gather fallback; not needed for this module's sizes (1000 x embed_dim).

    def _call(single_buffer_table):
        if single_buffer_table:
            table_spec = pl.BlockSpec(
                (n_classes_p, embed_dim_p), lambda i0, i1: (0, 0),
                pipeline_mode=pl.Buffered(1))   # resident: one buffer is enough
        else:
            table_spec = pl.BlockSpec(
                (n_classes_p, embed_dim_p), lambda i0, i1: (0, 0))
        return pl.pallas_call(
            _class_embed_kernel,
            out_shape=jax.ShapeDtypeStruct((b_total, embed_dim_p), table_padded.dtype),
            grid=(g0, g1),
            in_specs=[
                pl.BlockSpec((TB, 1), lambda i0, i1: (i0 * g1 + i1, 0)),
                table_spec,
            ],
            out_specs=pl.BlockSpec((TB, embed_dim_p), lambda i0, i1: (i0 * g1 + i1, 0)),
            scratch_shapes=[pltpu.VMEM((TB, n_classes_p), jnp.int32)],
            compiler_params=pltpu.CompilerParams(
                dimension_semantics=("parallel", "arbitrary"),
                vmem_limit_bytes=vmem_limit,
            ),
        )(idx2d, table_padded)

    if hasattr(pl, "Buffered"):
        try:
            gathered = _call(True)
        except Exception:
            # Fallback for toolchains where Buffered(1) on an input is rejected.
            gathered = _call(False)
    else:
        gathered = _call(False)

    return gathered[:B, :embed_dim]


class ClassEmbedder:
    """JAX/Pallas counterpart of the PyTorch ClassEmbedder module."""

    def __init__(self, embedding_table, key="class"):
        self.key = key
        self.n_classes, self.embed_dim = embedding_table.shape
        # Padding hoisted here (one-time), not in the per-call forward path.
        self.table = pad_embedding_table(embedding_table)

    def __call__(self, batch, key=None):
        if key is None:
            key = self.key
        c = batch[key]                                            # (B,) labels
        out = class_embed_lookup(c, self.table, self.n_classes, self.embed_dim)
        return out[:, None, :]                                    # (B, 1, embed_dim)


if __name__ == "__main__":
    # Small, deterministic setup consistent with the module's __init__ defaults.
    n_classes = 1000      # ClassEmbedder default
    embed_dim = 128
    batch_size = 4

    root = jax.random.PRNGKey(0)
    k_idx, k_emb, k_idx2 = jax.random.split(root, 3)

    # nn.Embedding default init: weight ~ N(0, 1)
    table = jax.random.normal(k_emb, (n_classes, embed_dim), dtype=jnp.float32)
    class_ids = jax.random.randint(k_idx, (batch_size,), 0, n_classes, dtype=jnp.int32)
    batch = {"class": class_ids}

    embedder = ClassEmbedder(table)                      # table pad done once here
    out = jax.block_until_ready(embedder(batch))

    ref = table[class_ids][:, None, :]
    assert out.shape == (batch_size, 1, embed_dim), out.shape
    assert out.dtype == jnp.float32, out.dtype
    assert jnp.array_equal(out, ref), "Pallas gather mismatch vs f32 reference"

    # bf16 table: halves table DMA/VMEM; one-hot selection is exact -> bit-equal.
    table_bf16 = table.astype(jnp.bfloat16)
    out_bf16 = jax.block_until_ready(ClassEmbedder(table_bf16)(batch))
    assert jnp.array_equal(out_bf16, table_bf16[class_ids][:, None, :]), \
        "Pallas gather mismatch vs bf16 reference"

    # Larger batch: exercises the multi-tile grid, cached-iota reuse across
    # steps, and (on 2-TC parts) the 2-way parallel split path.
    big_b = 1200
    big_ids = jax.random.randint(k_idx2, (big_b,), 0, n_classes, dtype=jnp.int32)
    out_big = jax.block_until_ready(embedder({"class": big_ids}))
    assert out_big.shape == (big_b, 1, embed_dim)
    assert jnp.array_equal(out_big, table[big_ids][:, None, :]), \
        "Pallas gather mismatch vs f32 reference (large batch)"

    print("KERNEL_OK")
</pallas_src>

<mosaic_0001>
module attributes {stable_mosaic.version = 11 : i64} {
  func.func @_class_embed_kernel(%arg0: i32, %arg1: i32, %arg2: memref<8x1xi32, #tpu.memory_space<vmem>>, %arg3: memref<1024x128xf32, #tpu.memory_space<vmem>>, %arg4: memref<8x128xf32, #tpu.memory_space<vmem>>, %arg5: memref<8x1024xi32, #tpu.memory_space<vmem>>) attributes {dimension_semantics = [#tpu.dimension_semantics<parallel>, #tpu.dimension_semantics<arbitrary>], iteration_bounds = array<i64: 1, 1>, scalar_prefetch = 0 : i64, scratch_operands = 1 : i64, tpu.core_type = #tpu.core_type<tc>, window_params = [{transform_indices = @transform_0, window_bounds = array<i64: 8, 1>}, {pipeline_mode = #tpu.pipeline_mode<synchronous>, transform_indices = @transform_1, window_bounds = array<i64: 1024, 128>}, {transform_indices = @transform_2, window_bounds = array<i64: 8, 128>}]} {
    %c0_i32 = arith.constant 0 : i32
    %0 = arith.cmpi eq, %arg1, %c0_i32 : i32
    %1 = arith.extui %0 : i1 to i32
    %c0_i32_0 = arith.constant 0 : i32
    %2 = arith.cmpi ne, %1, %c0_i32_0 : i32
    scf.if %2 {
      %12 = tpu.iota {dimensions = array<i32: 1>} : vector<8x1024xi32>
      %c0_8 = arith.constant 0 : index
      %c0_9 = arith.constant 0 : index
      %13 = vector.load %arg5[%c0_8, %c0_9] : memref<8x1024xi32, #tpu.memory_space<vmem>>, vector<8x1024xi32>
      tpu.vector_store %arg5[%c0_8, %c0_9], %12 {strides = array<i32>} : memref<8x1024xi32, #tpu.memory_space<vmem>>, vector<8x1024xi32>,
    } else {
    }
    %c0 = arith.constant 0 : index
    %c0_1 = arith.constant 0 : index
    %3 = vector.load %arg2[%c0, %c0_1] : memref<8x1xi32, #tpu.memory_space<vmem>>, vector<8x1xi32>
    %c0_2 = arith.constant 0 : index
    %c0_3 = arith.constant 0 : index
    %4 = vector.load %arg5[%c0_2, %c0_3] : memref<8x1024xi32, #tpu.memory_space<vmem>>, vector<8x1024xi32>
    %5 = vector.broadcast %3 : vector<8x1xi32> to vector<8x1024xi32>
    %6 = arith.cmpi eq, %5, %4 : vector<8x1024xi32>
    %7 = arith.extui %6 : vector<8x1024xi1> to vector<8x1024xi32>
    %8 = arith.sitofp %7 : vector<8x1024xi32> to vector<8x1024xf32>
    %c0_4 = arith.constant 0 : index
    %c0_5 = arith.constant 0 : index
    %9 = vector.load %arg3[%c0_4, %c0_5] : memref<1024x128xf32, #tpu.memory_space<vmem>>, vector<1024x128xf32>
    %cst = arith.constant dense<0.000000e+00> : vector<8x128xf32>
    %10 = tpu.matmul %8, %9, %cst {dimension_numbers = #tpu.dot_dimension_numbers<[1], [0], [0], [1], [0, 0, 1, 1], [], []>} : vector<8x1024xf32>, vector<1024x128xf32>, vector<8x128xf32> -> vector<8x128xf32>
    %c0_6 = arith.constant 0 : index
    %c0_7 = arith.constant 0 : index
    %11 = vector.load %arg4[%c0_6, %c0_7] : memref<8x128xf32, #tpu.memory_space<vmem>>, vector<8x128xf32>
    tpu.vector_store %arg4[%c0_6, %c0_7], %10 {strides = array<i32>} : memref<8x128xf32, #tpu.memory_space<vmem>>, vector<8x128xf32>,
    return
  }
  func.func @transform_0(%arg0: i32, %arg1: i32) -> (i32, i32) {
    %c1_i32 = arith.constant 1 : i32
    %0 = arith.muli %arg0, %c1_i32 : i32
    %1 = arith.addi %0, %arg1 : i32
    %c0_i32 = arith.constant 0 : i32
    %c0_i32_0 = arith.constant 0 : i32
    return %1, %c0_i32 : i32, i32
  }
  func.func @transform_1(%arg0: i32, %arg1: i32) -> (i32, i32) {
    %c0_i32 = arith.constant 0 : i32
    %c0_i32_0 = arith.constant 0 : i32
    %c0_i32_1 = arith.constant 0 : i32
    return %c0_i32, %c0_i32_0 : i32, i32
  }
  func.func @transform_2(%arg0: i32, %arg1: i32) -> (i32, i32) {
    %c1_i32 = arith.constant 1 : i32
    %0 = arith.muli %arg0, %c1_i32 : i32
    %1 = arith.addi %0, %arg1 : i32
    %c0_i32 = arith.constant 0 : i32
    %c0_i32_0 = arith.constant 0 : i32
    return %1, %c0_i32 : i32, i32
  }
}

module attributes {stable_mosaic.version = 11 : i64} {
  func.func @_class_embed_kernel(%arg0: i32, %arg1: i32, %arg2: memref<8x1xi32, #tpu.memory_space<vmem>>, %arg3: memref<1024x128xf32, #tpu.memory_space<vmem>>, %arg4: memref<8x128xf32, #tpu.memory_space<vmem>>, %arg5: memref<8x1024xi32, #tpu.memory_space<vmem>>) attributes {dimension_semantics = [#tpu.dimension_semantics<parallel>, #tpu.dimension_semantics<arbitrary>], iteration_bounds = array<i64: 1, 1>, scalar_prefetch = 0 : i64, scratch_operands = 1 : i64, tpu.core_type = #tpu.core_type<tc>, window_params = [{transform_indices = @transform_0, window_bounds = array<i64: 8, 1>}, {pipeline_mode = #tpu.pipeline_mode<synchronous>, transform_indices = @transform_1, window_bounds = array<i64: 1024, 128>}, {transform_indices = @transform_2, window_bounds = array<i64: 8, 128>}]} {
    %c0_i32 = arith.constant 0 : i32
    %0 = arith.cmpi eq, %arg1, %c0_i32 : i32
    %1 = arith.extui %0 : i1 to i32
    %c0_i32_0 = arith.constant 0 : i32
    %2 = arith.cmpi ne, %1, %c0_i32_0 : i32
    scf.if %2 {
      %12 = tpu.iota {dimensions = array<i32: 1>} : vector<8x1024xi32>
      %c0_8 = arith.constant 0 : index
      %c0_9 = arith.constant 0 : index
      %13 = vector.load %arg5[%c0_8, %c0_9] : memref<8x1024xi32, #tpu.memory_space<vmem>>, vector<8x1024xi32>
      tpu.vector_store %arg5[%c0_8, %c0_9], %12 {strides = array<i32>} : memref<8x1024xi32, #tpu.memory_space<vmem>>, vector<8x1024xi32>,
    } else {
    }
    %c0 = arith.constant 0 : index
    %c0_1 = arith.constant 0 : index
    %3 = vector.load %arg2[%c0, %c0_1] : memref<8x1xi32, #tpu.memory_space<vmem>>, vector<8x1xi32>
    %c0_2 = arith.constant 0 : index
    %c0_3 = arith.constant 0 : index
    %4 = vector.load %arg5[%c0_2, %c0_3] : memref<8x1024xi32, #tpu.memory_space<vmem>>, vector<8x1024xi32>
    %5 = vector.broadcast %3 : vector<8x1xi32> to vector<8x1024xi32>
    %6 = arith.cmpi eq, %5, %4 : vector<8x1024xi32>
    %7 = arith.extui %6 : vector<8x1024xi1> to vector<8x1024xi32>
    %8 = arith.sitofp %7 : vector<8x1024xi32> to vector<8x1024xf32>
    %c0_4 = arith.constant 0 : index
    %c0_5 = arith.constant 0 : index
    %9 = vector.load %arg3[%c0_4, %c0_5] : memref<1024x128xf32, #tpu.memory_space<vmem>>, vector<1024x128xf32>
    %cst = arith.constant dense<0.000000e+00> : vector<8x128xf32>
    %10 = tpu.matmul %8, %9, %cst {dimension_numbers = #tpu.dot_dimension_numbers<[1], [0], [0], [1], [0, 0, 1, 1], [], []>} : vector<8x1024xf32>, vector<1024x128xf32>, vector<8x128xf32> -> vector<8x128xf32>
    %c0_6 = arith.constant 0 : index
    %c0_7 = arith.constant 0 : index
    %11 = vector.load %arg4[%c0_6, %c0_7] : memref<8x128xf32, #tpu.memory_space<vmem>>, vector<8x128xf32>
    tpu.vector_store %arg4[%c0_6, %c0_7], %10 {strides = array<i32>} : memref<8x128xf32, #tpu.memory_space<vmem>>, vector<8x128xf32>,
    return
  }
  func.func @transform_0(%arg0: i32, %arg1: i32) -> (i32, i32) {
    %c1_i32 = arith.constant 1 : i32
    %0 = arith.muli %arg0, %c1_i32 : i32
    %1 = arith.addi %0, %arg1 : i32
    %c0_i32 = arith.constant 0 : i32
    %c0_i32_0 = arith.constant 0 : i32
    return %1, %c0_i32 : i32, i32
  }
  func.func @transform_1(%arg0: i32, %arg1: i32) -> (i32, i32) {
    %c0_i32 = arith.constant 0 : i32
    %c0_i32_0 = arith.constant 0 : i32
    %c0_i32_1 = arith.constant 0 : i32
    return %c0_i32, %c0_i32_0 : i32, i32
  }
  func.func @transform_2(%arg0: i32, %arg1: i32) -> (i32, i32) {
    %c1_i32 = arith.constant 1 : i32
    %0 = arith.muli %arg0, %c1_i32 : i32
    %1 = arith.addi %0, %arg1 : i32
    %c0_i32 = arith.constant 0 : i32
    %c0_i32_0 = arith.constant 0 : i32
    return %1, %c0_i32 : i32, i32
  }
}

</mosaic_0001>

<bundles_post_ra>
// kernel: tpu_custom_call.1
= control target key start
LH: loop header
LB: loop body
LE: loop exit
PB: predicated region body
PF: predicated region fallthrough
CT: control target
= control target key end

     0   :  { %7 = vsyncpa [#allocation4], 0  ;;  %s949_s0 = inlined_call_operand.vmem [shape: s32[8,1], index: 0, kind: input, shape index: {}]   ;;  %s950_s1 = inlined_call_operand.hbm [shape: f32[1024,128], index: 1, kind: input, shape index: {}]   ;;  %s951_s2 = inlined_call_operand.hbm [shape: f32[8,128], index: 2, kind: output, shape index: {}]  }
   0x1   :  { %8 = vsyncpa [#allocation5], 0  ;;  %s873_s9 = smov [#allocation3]   ;;  %s825_s13 = scalar_lea.hbm %s950_s1, 16384 }
   0x2   :  { %s22_s10 = sshll.u32 %s873_s9, 4  ;;  %p826_p0 = scmp.ne.s32.totalorder %s950_s1, %s825_s13  ;;  %s23_s10 = int_to_ptr.vmem [resolvable:$true] %s22_s10 }
   0x3   :  { %p829_p1 = scmp.lt.u32.totalorder %s825_s13, %s950_s1 }
   0x5   :  { %p831_p2 = pnand %p829_p1, %p826_p0 }
   0x7   :  { %834 = shalt.err (!%p831_p2)
}
   0x8   :  { %s835_s18 = scalar_lea.vmem %s23_s10, 16384  ;;  %p840_p4 = scmp.lt.s32.totalorder %s23_s10, %s23_s10 }
   0x9   :  { %p836_p3 = scmp.ne.s32.totalorder %s23_s10, %s835_s18  ;;  %p841_p5 = scmp.lt.s32.totalorder %s835_s18, %s835_s18 }
   0xb   :  { %p842_p6 = por %p841_p5, %p840_p4 }
   0xd   :  { %p843_p7 = pnand %p842_p6, %p836_p3 }
   0xf   :  { %846 = shalt.err (!%p843_p7)
}
  0x10   :  { %s874_s19 = smov 128   ;;  %s875_s20 = smov 8  }
  0x11   :  { %28 = dma.hbm_to_vmem [thread:$0]  %s950_s1, 16384, %s23_s10, [#allocation4], %s874_s19, %s874_s19, %s875_s20  }
  0x12   :  { %869 = dma.done.wait [#allocation4], 16384  }
  0x13   :  { %870 = vsyncadd [#allocation4], 4294950912  ;;  %v876_v0 = vmov 0   ;;  %v65_v1 = vld [vmem:[%s949_s0] sm:$0xff]  ;;  %v118_v3 = vld [vmem:[#allocation3 + $0x88] sm:$0xff]  ;;  %s878_s0 = smov [#allocation6]  }
  0x14   :  { %824 = vset.pattern.permute.xlu0 %v876_v0  ;;  %v117_v2 = vld [vmem:[#allocation3 + $0x80] sm:$0xff]  ;;  %v150_v6 = vld [vmem:[#allocation3 + $0x188] sm:$0xff]  ;;  %v119_v14 = vld [vmem:[#allocation3 + $0x90] sm:$0xff]  ;;  %s519_s1 = sshll.u32 %s878_s0, 4  ;;  %s520_s1 = int_to_ptr.vmem [resolvable:$true] %s519_s1 }
  0x15   :  { %75 = vperm.xlu0 %824, %v65_v1   ;;  %v690_v4 = vpack.c.bf16 %v118_v3, %v117_v2  ;;  %v149_v5 = vld [vmem:[#allocation3 + $0x180] sm:$0xff]  ;;  %v102_v9 = vld [vmem:[#allocation3 + $0x8] sm:$0xff]  ;;  %v120_v15 = vld [vmem:[#allocation3 + $0x98] sm:$0xff]  ;;  %s847_s25 = scalar_lea.vmem %s520_s1, 128  ;;  %p852_p9 = scmp.lt.s32.totalorder %s520_s1, %s520_s1 }
  0x16   :  { %v101_v7 = vld [vmem:[#allocation3] sm:$0xff]  ;;  %v722_v8 = vpack.c.bf16 %v150_v6, %v149_v5  ;;  %v134_v11 = vld [vmem:[#allocation3 + $0x108] sm:$0xff]  ;;  %v151_v16 = vld [vmem:[#allocation3 + $0x190] sm:$0xff]  ;;  %v694_v17 = vpack.c.bf16 %v120_v15, %v119_v14  ;;  %p848_p8 = scmp.ne.s32.totalorder %s520_s1, %s847_s25  ;;  %p853_p10 = scmp.lt.s32.totalorder %s847_s25, %s847_s25 }
  0x17   :  { %v133_v10 = vld [vmem:[#allocation3 + $0x100] sm:$0xff]  ;;  %691 = vmatprep.subr.bf16.mxu0 %v690_v4  ;;  %v692_v12 = vpack.c.bf16 %v102_v9, %v101_v7  ;;  %v152_v18 = vld [vmem:[#allocation3 + $0x198] sm:$0xff]  ;;  %v103_v19 = vld [vmem:[#allocation3 + $0x10] sm:$0xff] }
  0x18   :  { %v724_v13 = vpack.c.bf16 %v134_v11, %v133_v10  ;;  %723 = vmatprep.subr.bf16.mxu1 %v722_v8  ;;  %v104_v20 = vld [vmem:[#allocation3 + $0x18] sm:$0xff]  ;;  %v726_v21 = vpack.c.bf16 %v152_v18, %v151_v16  ;;  %v135_v23 = vld [vmem:[#allocation3 + $0x110] sm:$0xff]  ;;  %v121_v25 = vld [vmem:[#allocation3 + $0xa0] sm:$0xff]  ;;  %p854_p11 = por %p853_p10, %p852_p9 }
  0x19   :  { %693 = vmatpush3.bf16.msra.mxu0 %v692_v12  ;;  %v696_v22 = vpack.c.bf16 %v104_v20, %v103_v19  ;;  %v136_v24 = vld [vmem:[#allocation3 + $0x118] sm:$0xff]  ;;  %v122_v27 = vld [vmem:[#allocation3 + $0xa8] sm:$0xff]  ;;  %v153_v28 = vld [vmem:[#allocation3 + $0x1a0] sm:$0xff] }
  0x1a   :  { %725 = vmatpush3.bf16.msra.mxu1 %v724_v13  ;;  %695 = vmatprep.subr.bf16.mxu0 %v694_v17  ;;  %v728_v26 = vpack.c.bf16 %v136_v24, %v135_v23  ;;  %v154_v29 = vld [vmem:[#allocation3 + $0x1a8] sm:$0xff]  ;;  %v698_v30 = vpack.c.bf16 %v122_v27, %v121_v25  ;;  %v105_v32 = vld [vmem:[#allocation3 + $0x20] sm:$0xff]  ;;  %v123_v36 = vld [vmem:[#allocation3 + $0xb0] sm:$0xff]  ;;  %p855_p12 = pnand %p854_p11, %p848_p8 }
  0x1b   :  { %727 = vmatprep.subr.bf16.mxu1 %v726_v21  ;;  %v730_v31 = vpack.c.bf16 %v154_v29, %v153_v28  ;;  %v106_v33 = vld [vmem:[#allocation3 + $0x28] sm:$0xff]  ;;  %v137_v34 = vld [vmem:[#allocation3 + $0x120] sm:$0xff]  ;;  %v124_v37 = vld [vmem:[#allocation3 + $0xb8] sm:$0xff] }
  0x1c   :  { %v138_v35 = vld [vmem:[#allocation3 + $0x128] sm:$0xff]  ;;  %v700_v38 = vpack.c.bf16 %v106_v33, %v105_v32  ;;  %v155_v40 = vld [vmem:[#allocation3 + $0x1b0] sm:$0xff]  ;;  %v156_v41 = vld [vmem:[#allocation3 + $0x1b8] sm:$0xff]  ;;  %v702_v43 = vpack.c.bf16 %v124_v37, %v123_v36 }
  0x1d   :  { %697 = vmatpush3.bf16.msra.mxu0 %v696_v22  ;;  %v732_v39 = vpack.c.bf16 %v138_v35, %v137_v34  ;;  %v107_v42 = vld [vmem:[#allocation3 + $0x30] sm:$0xff]  ;;  %v734_v44 = vpack.c.bf16 %v156_v41, %v155_v40  ;;  %v108_v45 = vld [vmem:[#allocation3 + $0x38] sm:$0xff]  ;;  %v125_v48 = vld [vmem:[#allocation3 + $0xc0] sm:$0xff]  ;;  %v48_v40 = vlaneseq }
  0x1e   :  { %729 = vmatpush3.bf16.msra.mxu1 %v728_v26  ;;  %699 = vmatprep.subr.bf16.mxu0 %v698_v30  ;;  %v139_v46 = vld [vmem:[#allocation3 + $0x130] sm:$0xff]  ;;  %v140_v47 = vld [vmem:[#allocation3 + $0x138] sm:$0xff]  ;;  %v126_v49 = vld [vmem:[#allocation3 + $0xc8] sm:$0xff]  ;;  %v704_v52 = vpack.c.bf16 %v108_v45, %v107_v42 }
  0x1f   :  { %731 = vmatprep.subr.bf16.mxu1 %v730_v31  ;;  %v157_v50 = vld [vmem:[#allocation3 + $0x1c0] sm:$0xff]  ;;  %v158_v51 = vld [vmem:[#allocation3 + $0x1c8] sm:$0xff]  ;;  %v736_v53 = vpack.c.bf16 %v140_v47, %v139_v46  ;;  %v706_v56 = vpack.c.bf16 %v126_v49, %v125_v48  ;;  %v127_v60 = vld [vmem:[#allocation3 + $0xd0] sm:$0xff]  ;;  %v909_v41 = vand.u32 127, %v48_v40 }
  0x20   :  { %v109_v54 = vld [vmem:[#allocation3 + $0x40] sm:$0xff]  ;;  %v110_v55 = vld [vmem:[#allocation3 + $0x48] sm:$0xff]  ;;  %v738_v57 = vpack.c.bf16 %v158_v51, %v157_v50  ;;  %v128_v61 = vld [vmem:[#allocation3 + $0xd8] sm:$0xff] }
  0x21   :  { %701 = vmatpush3.bf16.msra.mxu0 %v700_v38  ;;  %v141_v58 = vld [vmem:[#allocation3 + $0x140] sm:$0xff]  ;;  %v142_v59 = vld [vmem:[#allocation3 + $0x148] sm:$0xff]  ;;  %v159_v62 = vld [vmem:[#allocation3 + $0x1d0] sm:$0xff]  ;;  %v708_v0 = vpack.c.bf16 %v110_v55, %v109_v54  ;;  %v710_v4 = vpack.c.bf16 %v128_v61, %v127_v60  ;;  %v51_v45 = vadd.s32 256, %v909_v41 }
  0x22   :  { %733 = vmatpush3.bf16.msra.mxu1 %v732_v39  ;;  %703 = vmatprep.subr.bf16.mxu0 %v702_v43  ;;  %v160_v63 = vld [vmem:[#allocation3 + $0x1d8] sm:$0xff]  ;;  %v740_v1 = vpack.c.bf16 %v142_v59, %v141_v58  ;;  %v111_v2 = vld [vmem:[#allocation3 + $0x50] sm:$0xff]  ;;  %v129_v8 = vld [vmem:[#allocation3 + $0xe0] sm:$0xff]  ;;  %v50_v43 = vadd.s32 128, %v909_v41 }
  0x23   :  { %735 = vmatprep.subr.bf16.mxu1 %v734_v44  ;;  %v112_v3 = vld [vmem:[#allocation3 + $0x58] sm:$0xff]  ;;  %v742_v5 = vpack.c.bf16 %v160_v63, %v159_v62  ;;  %v143_v6 = vld [vmem:[#allocation3 + $0x150] sm:$0xff]  ;;  %v130_v9 = vld [vmem:[#allocation3 + $0xe8] sm:$0xff]  ;;  %v52_v44 = vadd.s32 384, %v909_v41  ;;  %v877_v63 = vmov 1.0  }
  0x24   :  { %v144_v7 = vld [vmem:[#allocation3 + $0x158] sm:$0xff]  ;;  %v161_v10 = vld [vmem:[#allocation3 + $0x1e0] sm:$0xff]  ;;  %v162_v11 = vld [vmem:[#allocation3 + $0x1e8] sm:$0xff]  ;;  %v712_v12 = vpack.c.bf16 %v112_v3, %v111_v2  ;;  %v714_v16 = vpack.c.bf16 %v130_v9, %v129_v8 }
  0x25   :  { %705 = vmatpush3.bf16.msra.mxu0 %v704_v52  ;;  %v744_v13 = vpack.c.bf16 %v144_v7, %v143_v6  ;;  %v113_v14 = vld [vmem:[#allocation3 + $0x60] sm:$0xff]  ;;  %v114_v15 = vld [vmem:[#allocation3 + $0x68] sm:$0xff]  ;;  %v746_v17 = vpack.c.bf16 %v162_v11, %v161_v10  ;;  %v131_v20 = vld [vmem:[#allocation3 + $0xf0] sm:$0xff] }
  0x26   :  { %737 = vmatpush3.bf16.msra.mxu1 %v736_v53  ;;  %707 = vmatprep.subr.bf16.mxu0 %v706_v56  ;;  %v145_v18 = vld [vmem:[#allocation3 + $0x160] sm:$0xff]  ;;  %v146_v19 = vld [vmem:[#allocation3 + $0x168] sm:$0xff]  ;;  %v132_v21 = vld [vmem:[#allocation3 + $0xf8] sm:$0xff]  ;;  %v716_v24 = vpack.c.bf16 %v114_v15, %v113_v14  ;;  %v54_v56 = vadd.s32 640, %v909_v41 }
  0x27   :  { %739 = vmatprep.subr.bf16.mxu1 %v738_v57  ;;  %v163_v22 = vld [vmem:[#allocation3 + $0x1f0] sm:$0xff]  ;;  %v164_v23 = vld [vmem:[#allocation3 + $0x1f8] sm:$0xff]  ;;  %v748_v25 = vpack.c.bf16 %v146_v19, %v145_v18  ;;  %v718_v28 = vpack.c.bf16 %v132_v21, %v131_v20  ;;  %v181_v32 = vld [vmem:[#allocation3 + $0x280] sm:$0xff]  ;;  %v56_v57 = vadd.s32 896, %v909_v41 }
  0x28   :  { %v115_v26 = vld [vmem:[#allocation3 + $0x70] sm:$0xff]  ;;  %v116_v27 = vld [vmem:[#allocation3 + $0x78] sm:$0xff]  ;;  %v750_v29 = vpack.c.bf16 %v164_v23, %v163_v22  ;;  %v182_v33 = vld [vmem:[#allocation3 + $0x288] sm:$0xff] }
  0x29   :  { %709 = vmatpush3.bf16.msra.mxu0 %v708_v0  ;;  %v147_v30 = vld [vmem:[#allocation3 + $0x170] sm:$0xff]  ;;  %v148_v31 = vld [vmem:[#allocation3 + $0x178] sm:$0xff]  ;;  %v213_v34 = vld [vmem:[#allocation3 + $0x380] sm:$0xff]  ;;  %v720_v36 = vpack.c.bf16 %v116_v27, %v115_v26  ;;  %v754_v38 = vpack.c.bf16 %v182_v33, %v181_v32 }
  0x2a   :  { %741 = vmatpush3.bf16.msra.mxu1 %v740_v1  ;;  %711 = vmatprep.subr.bf16.mxu0 %v710_v4  ;;  %v214_v35 = vld [vmem:[#allocation3 + $0x388] sm:$0xff]  ;;  %v752_v37 = vpack.c.bf16 %v148_v31, %v147_v30  ;;  %v165_v42 = vld [vmem:[#allocation3 + $0x200] sm:$0xff]  ;;  %v183_v49 = vld [vmem:[#allocation3 + $0x290] sm:$0xff] }
  0x2b   :  { %743 = vmatprep.subr.bf16.mxu1 %v742_v5  ;;  %v786_v39 = vpack.c.bf16 %v214_v35, %v213_v34  ;;  %v166_v46 = vld [vmem:[#allocation3 + $0x208] sm:$0xff]  ;;  %v197_v47 = vld [vmem:[#allocation3 + $0x300] sm:$0xff]  ;;  %v184_v50 = vld [vmem:[#allocation3 + $0x298] sm:$0xff] }
  0x2c   :  { %v198_v48 = vld [vmem:[#allocation3 + $0x308] sm:$0xff]  ;;  %v215_v51 = vld [vmem:[#allocation3 + $0x390] sm:$0xff]  ;;  %v216_v52 = vld [vmem:[#allocation3 + $0x398] sm:$0xff]  ;;  %v756_v54 = vpack.c.bf16 %v166_v46, %v165_v42  ;;  %v758_v0 = vpack.c.bf16 %v184_v50, %v183_v49 }
  0x2d   :  { %713 = vmatpush3.bf16.msra.mxu0 %v712_v12  ;;  %v788_v55 = vpack.c.bf16 %v198_v48, %v197_v47  ;;  %v167_v58 = vld [vmem:[#allocation3 + $0x210] sm:$0xff]  ;;  %v168_v59 = vld [vmem:[#allocation3 + $0x218] sm:$0xff]  ;;  %v185_v62 = vld [vmem:[#allocation3 + $0x2a0] sm:$0xff]  ;;  %v790_v1 = vpack.c.bf16 %v216_v52, %v215_v51 }
  0x2e   :  { %745 = vmatpush3.bf16.msra.mxu1 %v744_v13  ;;  %715 = vmatprep.subr.bf16.mxu0 %v714_v16  ;;  %v199_v60 = vld [vmem:[#allocation3 + $0x310] sm:$0xff]  ;;  %v200_v61 = vld [vmem:[#allocation3 + $0x318] sm:$0xff]  ;;  %v186_v2 = vld [vmem:[#allocation3 + $0x2a8] sm:$0xff]  ;;  %v760_v5 = vpack.c.bf16 %v168_v59, %v167_v58 }
  0x2f   :  { %747 = vmatprep.subr.bf16.mxu1 %v746_v17  ;;  %v217_v3 = vld [vmem:[#allocation3 + $0x3a0] sm:$0xff]  ;;  %v218_v4 = vld [vmem:[#allocation3 + $0x3a8] sm:$0xff]  ;;  %v792_v6 = vpack.c.bf16 %v200_v61, %v199_v60  ;;  %v762_v9 = vpack.c.bf16 %v186_v2, %v185_v62  ;;  %v187_v13 = vld [vmem:[#allocation3 + $0x2b0] sm:$0xff] }
  0x30   :  { %v169_v7 = vld [vmem:[#allocation3 + $0x220] sm:$0xff]  ;;  %v170_v8 = vld [vmem:[#allocation3 + $0x228] sm:$0xff]  ;;  %v794_v10 = vpack.c.bf16 %v218_v4, %v217_v3  ;;  %v188_v14 = vld [vmem:[#allocation3 + $0x2b8] sm:$0xff] }
  0x31   :  { %717 = vmatpush3.bf16.msra.mxu0 %v716_v24  ;;  %v201_v11 = vld [vmem:[#allocation3 + $0x320] sm:$0xff]  ;;  %v202_v12 = vld [vmem:[#allocation3 + $0x328] sm:$0xff]  ;;  %v219_v15 = vld [vmem:[#allocation3 + $0x3b0] sm:$0xff]  ;;  %v764_v17 = vpack.c.bf16 %v170_v8, %v169_v7  ;;  %v766_v21 = vpack.c.bf16 %v188_v14, %v187_v13  ;;  %v53_v14 = vadd.s32 512, %v909_v41 }
  0x32   :  { %749 = vmatpush3.bf16.msra.mxu1 %v748_v25  ;;  %719 = vmatprep.subr.bf16.mxu0 %v718_v28  ;;  %v220_v16 = vld [vmem:[#allocation3 + $0x3b8] sm:$0xff]  ;;  %v796_v18 = vpack.c.bf16 %v202_v12, %v201_v11  ;;  %v171_v19 = vld [vmem:[#allocation3 + $0x230] sm:$0xff]  ;;  %v189_v25 = vld [vmem:[#allocation3 + $0x2c0] sm:$0xff] }
  0x33   :  { %751 = vmatprep.subr.bf16.mxu1 %v750_v29  ;;  %v172_v20 = vld [vmem:[#allocation3 + $0x238] sm:$0xff]  ;;  %v798_v22 = vpack.c.bf16 %v220_v16, %v219_v15  ;;  %v203_v23 = vld [vmem:[#allocation3 + $0x330] sm:$0xff]  ;;  %v190_v26 = vld [vmem:[#allocation3 + $0x2c8] sm:$0xff]  ;;  %v55_v15 = vadd.s32 768, %v909_v41 }
  0x34   :  { %v204_v24 = vld [vmem:[#allocation3 + $0x338] sm:$0xff]  ;;  %v221_v27 = vld [vmem:[#allocation3 + $0x3c0] sm:$0xff]  ;;  %v222_v28 = vld [vmem:[#allocation3 + $0x3c8] sm:$0xff]  ;;  %v768_v29 = vpack.c.bf16 %v172_v20, %v171_v19  ;;  %v770_v33 = vpack.c.bf16 %v190_v26, %v189_v25 }
  0x35   :  { %721 = vmatpush3.bf16.msra.mxu0 %v720_v36  ;;  %v800_v30 = vpack.c.bf16 %v204_v24, %v203_v23  ;;  %v173_v31 = vld [vmem:[#allocation3 + $0x240] sm:$0xff]  ;;  %v174_v32 = vld [vmem:[#allocation3 + $0x248] sm:$0xff]  ;;  %v802_v34 = vpack.c.bf16 %v222_v28, %v221_v27  ;;  %v224_v40 = vld [vmem:[#allocation3 + $0x3d8] sm:$0xff] }
  0x36   :  { %753 = vmatpush3.bf16.msra.mxu1 %v752_v37  ;;  %755 = vmatprep.subr.bf16.mxu0 %v754_v38  ;;  %v205_v35 = vld [vmem:[#allocation3 + $0x340] sm:$0xff]  ;;  %v206_v36 = vld [vmem:[#allocation3 + $0x348] sm:$0xff]  ;;  %v191_v37 = vld [vmem:[#allocation3 + $0x2d0] sm:$0xff]  ;;  %v772_v42 = vpack.c.bf16 %v174_v32, %v173_v31 }
  0x37   :  { %787 = vmatprep.subr.bf16.mxu1 %v786_v39  ;;  %v192_v38 = vld [vmem:[#allocation3 + $0x2d8] sm:$0xff]  ;;  %v223_v39 = vld [vmem:[#allocation3 + $0x3d0] sm:$0xff]  ;;  %v193_v50 = vld [vmem:[#allocation3 + $0x2e0] sm:$0xff] }
  0x38   :  { %v774_v46 = vpack.c.bf16 %v192_v38, %v191_v37  ;;  %v806_v47 = vpack.c.bf16 %v224_v40, %v223_v39  ;;  %v207_v48 = vld [vmem:[#allocation3 + $0x350] sm:$0xff]  ;;  %v208_v49 = vld [vmem:[#allocation3 + $0x358] sm:$0xff]  ;;  %v194_v51 = vld [vmem:[#allocation3 + $0x2e8] sm:$0xff] }
  0x39   :  { %v225_v52 = vld [vmem:[#allocation3 + $0x3e0] sm:$0xff]  ;;  %v178_v58 = vld [vmem:[#allocation3 + $0x268] sm:$0xff]  ;;  %v778_v59 = vpack.c.bf16 %v194_v51, %v193_v50  ;;  %v227_v2 = vld [vmem:[#allocation3 + $0x3f0] sm:$0xff] }
  0x3a   :  { %v209_v61 = vld [vmem:[#allocation3 + $0x360] sm:$0xff]  ;;  %v210_v62 = vld [vmem:[#allocation3 + $0x368] sm:$0xff]  ;;  %v228_v3 = vld [vmem:[#allocation3 + $0x3f8] sm:$0xff] }
  0x3b   :  { %v814_v8 = vpack.c.bf16 %v228_v3, %v227_v2  ;;  %v212_v11 = vld [vmem:[#allocation3 + $0x378] sm:$0xff] }
  0x94   :  { %v914_v53 = vpop.permute.xlu0 %75 }
  0x95   :  { %vm78_vm0 = vcmp.eq.s32.totalorder %v914_v53, %v50_v43  ;;  %vm80_vm1 = vcmp.eq.s32.totalorder %v914_v53, %v52_v44  ;;  %vm77_vm2 = vcmp.eq.s32.totalorder %v914_v53, %v909_v41  ;;  %vm79_vm3 = vcmp.eq.s32.totalorder %v914_v53, %v51_v45  ;;  %v175_v44 = vld [vmem:[#allocation3 + $0x250] sm:$0xff]  ;;  %v176_v45 = vld [vmem:[#allocation3 + $0x258] sm:$0xff] }
  0x96   :  { %542 = vmatprep.mubr.msk.f32.mxu0 %vm78_vm0, %v877_v63  ;;  %544 = vmatprep.mubr.msk.f32.mxu1 %vm80_vm1, %v877_v63  ;;  %vm82_vm4 = vcmp.eq.s32.totalorder %v914_v53, %v54_v56  ;;  %vm84_vm5 = vcmp.eq.s32.totalorder %v914_v53, %v56_v57  ;;  %v804_v43 = vpack.c.bf16 %v206_v36, %v205_v35  ;;  %v177_v57 = vld [vmem:[#allocation3 + $0x260] sm:$0xff] }
  0x97   :  { %543 = vmatmul.mubr.msk.f32.vlgmr.msra.gmra.mrb[0].mxu0 %vm77_vm2, %v877_v63  ;;  %545 = vmatmul.mubr.msk.f32.vlgmr.msra.gmra.mrb[0].mxu1 %vm79_vm3, %v877_v63  ;;  %v808_v56 = vpack.c.bf16 %v208_v49, %v207_v48  ;;  %v780_v4 = vpack.c.bf16 %v178_v58, %v177_v57  ;;  %vm81_vm6 = vcmp.eq.s32.totalorder %v914_v53, %v53_v14 }
  0x98   :  { %757 = vmatpush3.bf16.msra.mxu0 %v756_v54  ;;  %789 = vmatpush3.bf16.msra.mxu1 %v788_v55  ;;  %v226_v54 = vld [vmem:[#allocation3 + $0x3e8] sm:$0xff]  ;;  %v776_v55 = vpack.c.bf16 %v176_v45, %v175_v44  ;;  %vm83_vm7 = vcmp.eq.s32.totalorder %v914_v53, %v55_v15 }
  0x99   :  { %546 = vmatprep.mubr.msk.f32.mxu0 %vm82_vm4, %v877_v63  ;;  %548 = vmatprep.mubr.msk.f32.mxu1 %vm84_vm5, %v877_v63  ;;  %v810_v60 = vpack.c.bf16 %v226_v54, %v225_v52 }
  0x9a   :  { %759 = vmatprep.subr.bf16.mxu0 %v758_v0  ;;  %791 = vmatprep.subr.bf16.mxu1 %v790_v1  ;;  %v195_v0 = vld [vmem:[#allocation3 + $0x2f0] sm:$0xff]  ;;  %v196_v1 = vld [vmem:[#allocation3 + $0x2f8] sm:$0xff] }
  0x9b   :  { %v782_v7 = vpack.c.bf16 %v196_v1, %v195_v0 }
  0x9c   :  { %761 = vmatpush3.bf16.msra.mxu0 %v760_v5  ;;  %793 = vmatpush3.bf16.msra.mxu1 %v792_v6  ;;  %v812_v5 = vpack.c.bf16 %v210_v62, %v209_v61  ;;  %v179_v6 = vld [vmem:[#allocation3 + $0x270] sm:$0xff] }
  0x9d   :  { %763 = vmatprep.subr.bf16.mxu0 %v762_v9  ;;  %795 = vmatprep.subr.bf16.mxu1 %v794_v10  ;;  %v180_v9 = vld [vmem:[#allocation3 + $0x278] sm:$0xff]  ;;  %v211_v10 = vld [vmem:[#allocation3 + $0x370] sm:$0xff] }
  0x9e   :  { %v784_v12 = vpack.c.bf16 %v180_v9, %v179_v6  ;;  %v816_v13 = vpack.c.bf16 %v212_v11, %v211_v10 }
  0xa0   :  { %765 = vmatpush3.bf16.msra.mxu0 %v764_v17  ;;  %797 = vmatpush3.bf16.msra.mxu1 %v796_v18 }
  0xa1   :  { %767 = vmatprep.subr.bf16.mxu0 %v766_v21  ;;  %799 = vmatprep.subr.bf16.mxu1 %v798_v22 }
  0xa4   :  { %769 = vmatpush3.bf16.msra.mxu0 %v768_v29  ;;  %801 = vmatpush3.bf16.msra.mxu1 %v800_v30 }
  0xa5   :  { %771 = vmatprep.subr.bf16.mxu0 %v770_v33  ;;  %803 = vmatprep.subr.bf16.mxu1 %v802_v34 }
  0xa8   :  { %773 = vmatpush3.bf16.msra.mxu0 %v772_v42  ;;  %805 = vmatpush3.bf16.msra.mxu1 %v804_v43 }
  0xa9   :  { %775 = vmatprep.subr.bf16.mxu0 %v774_v46  ;;  %807 = vmatprep.subr.bf16.mxu1 %v806_v47 }
  0xac   :  { %777 = vmatpush3.bf16.msra.mxu0 %v776_v55  ;;  %809 = vmatpush3.bf16.msra.mxu1 %v808_v56 }
  0xad   :  { %779 = vmatprep.subr.bf16.mxu0 %v778_v59  ;;  %811 = vmatprep.subr.bf16.mxu1 %v810_v60 }
  0xb0   :  { %781 = vmatpush3.bf16.msra.mxu0 %v780_v4  ;;  %813 = vmatpush3.bf16.msra.mxu1 %v812_v5 }
  0xb1   :  { %783 = vmatprep.subr.bf16.mxu0 %v782_v7  ;;  %815 = vmatprep.subr.bf16.mxu1 %v814_v8 }
  0xb4   :  { %785 = vmatpush3.bf16.msra.mxu0 %v784_v12  ;;  %817 = vmatpush3.bf16.msra.mxu1 %v816_v13 }
  0xb7   :  { %547 = vmatmul.mubr.msk.f32.vlgmr.msra.gmra.mrb[2].mxu0 %vm81_vm6, %v877_v63  ;;  %549 = vmatmul.mubr.msk.f32.vlgmr.msra.gmra.mrb[2].mxu1 %vm83_vm7, %v877_v63 }
 0x16a   :  { %v582_v16 = vpop.f32.mrb[0].mxu0  ;;  %v617_v17 = vpop.f32.mrb[0].mxu1 }
 0x16b   :  { %v583_v18 = vpop.f32.mrb[1].mxu0  ;;  %v618_v19 = vpop.f32.mrb[1].mxu1 }
 0x16c   :  { %v584_v20 = vadd.f32 %v583_v18, %v582_v16  ;;  %v619_v21 = vadd.f32 %v618_v19, %v617_v17 }
 0x16e   :  { %v366_v22 = vadd.f32 %v619_v21, %v584_v20 }
 0x18a   :  { %v652_v23 = vpop.f32.mrb[2].mxu0  ;;  %v687_v24 = vpop.f32.mrb[2].mxu1 }
 0x18b   :  { %v653_v41 = vpop.f32.mrb[3].mxu0  ;;  %v688_v25 = vpop.f32.mrb[3].mxu1 }
 0x18c   :  { %v654_v26 = vadd.f32 %v653_v41, %v652_v23  ;;  %v689_v27 = vadd.f32 %v688_v25, %v687_v24 }
 0x18e   :  { %v436_v53 = vadd.f32 %v654_v26, %v366_v22 }
 0x190   :  { %v506_v28 = vadd.f32 %v689_v27, %v436_v53 }
 0x192   :  { %509 = vst [vmem:[#allocation6] sm:$0xff] %v506_v28 }
 0x193   :  { %858 = shalt.err (!%p855_p12)
}
 0x194   :  { %s859_s28 = scalar_lea.hbm %s951_s2, 128 }
 0x195   :  { %p860_p13 = scmp.ne.s32.totalorder %s951_s2, %s859_s28  ;;  %p863_p0 = scmp.lt.u32.totalorder %s859_s28, %s951_s2 }
 0x197   :  { %p865_p1 = pnand %p863_p0, %p860_p13 }
 0x199   :  { %868 = shalt.err (!%p865_p1)
}
 0x19a   :  { %522 = dma.vmem_to_hbm [thread:$0]  %s520_s1, 128, %s951_s2, [#allocation5]  }
 0x19b   :  { %871 = dma.done.wait [#allocation5], 128  }
 0x19c   :  { %872 = vsyncadd [#allocation5], 4294967168 }
 0x19d   :  { %526 = vsyncpa [#allocation4], 1 }
 0x19e   :  { %527 = vsyncpa [#allocation5], 1 }

// kernel: tpu_custom_call.1
= control target key start
LH: loop header
LB: loop body
LE: loop exit
PB: predicated region body
PF: predicated region fallthrough
CT: control target
= control target key end

     0   :  { %7 = vsyncpa [#allocation4], 0  ;;  %s949_s0 = inlined_call_operand.vmem [shape: s32[8,1], index: 0, kind: input, shape index: {}]   ;;  %s950_s1 = inlined_call_operand.hbm [shape: f32[1024,128], index: 1, kind: input, shape index: {}]   ;;  %s951_s2 = inlined_call_operand.hbm [shape: f32[8,128], index: 2, kind: output, shape index: {}]  }
   0x1   :  { %8 = vsyncpa [#allocation5], 0  ;;  %s873_s9 = smov [#allocation3]   ;;  %s825_s13 = scalar_lea.hbm %s950_s1, 16384 }
   0x2   :  { %s22_s10 = sshll.u32 %s873_s9, 4  ;;  %p826_p0 = scmp.ne.s32.totalorder %s950_s1, %s825_s13  ;;  %s23_s10 = int_to_ptr.vmem [resolvable:$true] %s22_s10 }
   0x3   :  { %p829_p1 = scmp.lt.u32.totalorder %s825_s13, %s950_s1 }
   0x5   :  { %p831_p2 = pnand %p829_p1, %p826_p0 }
   0x7   :  { %834 = shalt.err (!%p831_p2)
}
   0x8   :  { %s835_s18 = scalar_lea.vmem %s23_s10, 16384  ;;  %p840_p4 = scmp.lt.s32.totalorder %s23_s10, %s23_s10 }
   0x9   :  { %p836_p3 = scmp.ne.s32.totalorder %s23_s10, %s835_s18  ;;  %p841_p5 = scmp.lt.s32.totalorder %s835_s18, %s835_s18 }
   0xb   :  { %p842_p6 = por %p841_p5, %p840_p4 }
   0xd   :  { %p843_p7 = pnand %p842_p6, %p836_p3 }
   0xf   :  { %846 = shalt.err (!%p843_p7)
}
  0x10   :  { %s874_s19 = smov 128   ;;  %s875_s20 = smov 8  }
  0x11   :  { %28 = dma.hbm_to_vmem [thread:$0]  %s950_s1, 16384, %s23_s10, [#allocation4], %s874_s19, %s874_s19, %s875_s20  }
  0x12   :  { %869 = dma.done.wait [#allocation4], 16384  }
  0x13   :  { %870 = vsyncadd [#allocation4], 4294950912  ;;  %v876_v0 = vmov 0   ;;  %v65_v1 = vld [vmem:[%s949_s0] sm:$0xff]  ;;  %v118_v3 = vld [vmem:[#allocation3 + $0x88] sm:$0xff]  ;;  %s878_s0 = smov [#allocation6]  }
  0x14   :  { %824 = vset.pattern.permute.xlu0 %v876_v0  ;;  %v117_v2 = vld [vmem:[#allocation3 + $0x80] sm:$0xff]  ;;  %v150_v6 = vld [vmem:[#allocation3 + $0x188] sm:$0xff]  ;;  %v119_v14 = vld [vmem:[#allocation3 + $0x90] sm:$0xff]  ;;  %s519_s1 = sshll.u32 %s878_s0, 4  ;;  %s520_s1 = int_to_ptr.vmem [resolvable:$true] %s519_s1 }
  0x15   :  { %75 = vperm.xlu0 %824, %v65_v1   ;;  %v690_v4 = vpack.c.bf16 %v118_v3, %v117_v2  ;;  %v149_v5 = vld [vmem:[#allocation3 + $0x180] sm:$0xff]  ;;  %v102_v9 = vld [vmem:[#allocation3 + $0x8] sm:$0xff]  ;;  %v120_v15 = vld [vmem:[#allocation3 + $0x98] sm:$0xff]  ;;  %s847_s25 = scalar_lea.vmem %s520_s1, 128  ;;  %p852_p9 = scmp.lt.s32.totalorder %s520_s1, %s520_s1 }
  0x16   :  { %v101_v7 = vld [vmem:[#allocation3] sm:$0xff]  ;;  %v722_v8 = vpack.c.bf16 %v150_v6, %v149_v5  ;;  %v134_v11 = vld [vmem:[#allocation3 + $0x108] sm:$0xff]  ;;  %v151_v16 = vld [vmem:[#allocation3 + $0x190] sm:$0xff]  ;;  %v694_v17 = vpack.c.bf16 %v120_v15, %v119_v14  ;;  %p848_p8 = scmp.ne.s32.totalorder %s520_s1, %s847_s25  ;;  %p853_p10 = scmp.lt.s32.totalorder %s847_s25, %s847_s25 }
  0x17   :  { %v133_v10 = vld [vmem:[#allocation3 + $0x100] sm:$0xff]  ;;  %691 = vmatprep.subr.bf16.mxu0 %v690_v4  ;;  %v692_v12 = vpack.c.bf16 %v102_v9, %v101_v7  ;;  %v152_v18 = vld [vmem:[#allocation3 + $0x198] sm:$0xff]  ;;  %v103_v19 = vld [vmem:[#allocation3 + $0x10] sm:$0xff] }
  0x18   :  { %v724_v13 = vpack.c.bf16 %v134_v11, %v133_v10  ;;  %723 = vmatprep.subr.bf16.mxu1 %v722_v8  ;;  %v104_v20 = vld [vmem:[#allocation3 + $0x18] sm:$0xff]  ;;  %v726_v21 = vpack.c.bf16 %v152_v18, %v151_v16  ;;  %v135_v23 = vld [vmem:[#allocation3 + $0x110] sm:$0xff]  ;;  %v121_v25 = vld [vmem:[#allocation3 + $0xa0] sm:$0xff]  ;;  %p854_p11 = por %p853_p10, %p852_p9 }
  0x19   :  { %693 = vmatpush3.bf16.msra.mxu0 %v692_v12  ;;  %v696_v22 = vpack.c.bf16 %v104_v20, %v103_v19  ;;  %v136_v24 = vld [vmem:[#allocation3 + $0x118] sm:$0xff]  ;;  %v122_v27 = vld [vmem:[#allocation3 + $0xa8] sm:$0xff]  ;;  %v153_v28 = vld [vmem:[#allocation3 + $0x1a0] sm:$0xff] }
  0x1a   :  { %725 = vmatpush3.bf16.msra.mxu1 %v724_v13  ;;  %695 = vmatprep.subr.bf16.mxu0 %v694_v17  ;;  %v728_v26 = vpack.c.bf16 %v136_v24, %v135_v23  ;;  %v154_v29 = vld [vmem:[#allocation3 + $0x1a8] sm:$0xff]  ;;  %v698_v30 = vpack.c.bf16 %v122_v27, %v121_v25  ;;  %v105_v32 = vld [vmem:[#allocation3 + $0x20] sm:$0xff]  ;;  %v123_v36 = vld [vmem:[#allocation3 + $0xb0] sm:$0xff]  ;;  %p855_p12 = pnand %p854_p11, %p848_p8 }
  0x1b   :  { %727 = vmatprep.subr.bf16.mxu1 %v726_v21  ;;  %v730_v31 = vpack.c.bf16 %v154_v29, %v153_v28  ;;  %v106_v33 = vld [vmem:[#allocation3 + $0x28] sm:$0xff]  ;;  %v137_v34 = vld [vmem:[#allocation3 + $0x120] sm:$0xff]  ;;  %v124_v37 = vld [vmem:[#allocation3 + $0xb8] sm:$0xff] }
  0x1c   :  { %v138_v35 = vld [vmem:[#allocation3 + $0x128] sm:$0xff]  ;;  %v700_v38 = vpack.c.bf16 %v106_v33, %v105_v32  ;;  %v155_v40 = vld [vmem:[#allocation3 + $0x1b0] sm:$0xff]  ;;  %v156_v41 = vld [vmem:[#allocation3 + $0x1b8] sm:$0xff]  ;;  %v702_v43 = vpack.c.bf16 %v124_v37, %v123_v36 }
  0x1d   :  { %697 = vmatpush3.bf16.msra.mxu0 %v696_v22  ;;  %v732_v39 = vpack.c.bf16 %v138_v35, %v137_v34  ;;  %v107_v42 = vld [vmem:[#allocation3 + $0x30] sm:$0xff]  ;;  %v734_v44 = vpack.c.bf16 %v156_v41, %v155_v40  ;;  %v108_v45 = vld [vmem:[#allocation3 + $0x38] sm:$0xff]  ;;  %v125_v48 = vld [vmem:[#allocation3 + $0xc0] sm:$0xff]  ;;  %v48_v40 = vlaneseq }
  0x1e   :  { %729 = vmatpush3.bf16.msra.mxu1 %v728_v26  ;;  %699 = vmatprep.subr.bf16.mxu0 %v698_v30  ;;  %v139_v46 = vld [vmem:[#allocation3 + $0x130] sm:$0xff]  ;;  %v140_v47 = vld [vmem:[#allocation3 + $0x138] sm:$0xff]  ;;  %v126_v49 = vld [vmem:[#allocation3 + $0xc8] sm:$0xff]  ;;  %v704_v52 = vpack.c.bf16 %v108_v45, %v107_v42 }
  0x1f   :  { %731 = vmatprep.subr.bf16.mxu1 %v730_v31  ;;  %v157_v50 = vld [vmem:[#allocation3 + $0x1c0] sm:$0xff]  ;;  %v158_v51 = vld [vmem:[#allocation3 + $0x1c8] sm:$0xff]  ;;  %v736_v53 = vpack.c.bf16 %v140_v47, %v139_v46  ;;  %v706_v56 = vpack.c.bf16 %v126_v49, %v125_v48  ;;  %v127_v60 = vld [vmem:[#allocation3 + $0xd0] sm:$0xff]  ;;  %v909_v41 = vand.u32 127, %v48_v40 }
  0x20   :  { %v109_v54 = vld [vmem:[#allocation3 + $0x40] sm:$0xff]  ;;  %v110_v55 = vld [vmem:[#allocation3 + $0x48] sm:$0xff]  ;;  %v738_v57 = vpack.c.bf16 %v158_v51, %v157_v50  ;;  %v128_v61 = vld [vmem:[#allocation3 + $0xd8] sm:$0xff] }
  0x21   :  { %701 = vmatpush3.bf16.msra.mxu0 %v700_v38  ;;  %v141_v58 = vld [vmem:[#allocation3 + $0x140] sm:$0xff]  ;;  %v142_v59 = vld [vmem:[#allocation3 + $0x148] sm:$0xff]  ;;  %v159_v62 = vld [vmem:[#allocation3 + $0x1d0] sm:$0xff]  ;;  %v708_v0 = vpack.c.bf16 %v110_v55, %v109_v54  ;;  %v710_v4 = vpack.c.bf16 %v128_v61, %v127_v60  ;;  %v51_v45 = vadd.s32 256, %v909_v41 }
  0x22   :  { %733 = vmatpush3.bf16.msra.mxu1 %v732_v39  ;;  %703 = vmatprep.subr.bf16.mxu0 %v702_v43  ;;  %v160_v63 = vld [vmem:[#allocation3 + $0x1d8] sm:$0xff]  ;;  %v740_v1 = vpack.c.bf16 %v142_v59, %v141_v58  ;;  %v111_v2 = vld [vmem:[#allocation3 + $0x50] sm:$0xff]  ;;  %v129_v8 = vld [vmem:[#allocation3 + $0xe0] sm:$0xff]  ;;  %v50_v43 = vadd.s32 128, %v909_v41 }
  0x23   :  { %735 = vmatprep.subr.bf16.mxu1 %v734_v44  ;;  %v112_v3 = vld [vmem:[#allocation3 + $0x58] sm:$0xff]  ;;  %v742_v5 = vpack.c.bf16 %v160_v63, %v159_v62  ;;  %v143_v6 = vld [vmem:[#allocation3 + $0x150] sm:$0xff]  ;;  %v130_v9 = vld [vmem:[#allocation3 + $0xe8] sm:$0xff]  ;;  %v52_v44 = vadd.s32 384, %v909_v41  ;;  %v877_v63 = vmov 1.0  }
  0x24   :  { %v144_v7 = vld [vmem:[#allocation3 + $0x158] sm:$0xff]  ;;  %v161_v10 = vld [vmem:[#allocation3 + $0x1e0] sm:$0xff]  ;;  %v162_v11 = vld [vmem:[#allocation3 + $0x1e8] sm:$0xff]  ;;  %v712_v12 = vpack.c.bf16 %v112_v3, %v111_v2  ;;  %v714_v16 = vpack.c.bf16 %v130_v9, %v129_v8 }
  0x25   :  { %705 = vmatpush3.bf16.msra.mxu0 %v704_v52  ;;  %v744_v13 = vpack.c.bf16 %v144_v7, %v143_v6  ;;  %v113_v14 = vld [vmem:[#allocation3 + $0x60] sm:$0xff]  ;;  %v114_v15 = vld [vmem:[#allocation3 + $0x68] sm:$0xff]  ;;  %v746_v17 = vpack.c.bf16 %v162_v11, %v161_v10  ;;  %v131_v20 = vld [vmem:[#allocation3 + $0xf0] sm:$0xff] }
  0x26   :  { %737 = vmatpush3.bf16.msra.mxu1 %v736_v53  ;;  %707 = vmatprep.subr.bf16.mxu0 %v706_v56  ;;  %v145_v18 = vld [vmem:[#allocation3 + $0x160] sm:$0xff]  ;;  %v146_v19 = vld [vmem:[#allocation3 + $0x168] sm:$0xff]  ;;  %v132_v21 = vld [vmem:[#allocation3 + $0xf8] sm:$0xff]  ;;  %v716_v24 = vpack.c.bf16 %v114_v15, %v113_v14  ;;  %v54_v56 = vadd.s32 640, %v909_v41 }
  0x27   :  { %739 = vmatprep.subr.bf16.mxu1 %v738_v57  ;;  %v163_v22 = vld [vmem:[#allocation3 + $0x1f0] sm:$0xff]  ;;  %v164_v23 = vld [vmem:[#allocation3 + $0x1f8] sm:$0xff]  ;;  %v748_v25 = vpack.c.bf16 %v146_v19, %v145_v18  ;;  %v718_v28 = vpack.c.bf16 %v132_v21, %v131_v20  ;;  %v181_v32 = vld [vmem:[#allocation3 + $0x280] sm:$0xff]  ;;  %v56_v57 = vadd.s32 896, %v909_v41 }
  0x28   :  { %v115_v26 = vld [vmem:[#allocation3 + $0x70] sm:$0xff]  ;;  %v116_v27 = vld [vmem:[#allocation3 + $0x78] sm:$0xff]  ;;  %v750_v29 = vpack.c.bf16 %v164_v23, %v163_v22  ;;  %v182_v33 = vld [vmem:[#allocation3 + $0x288] sm:$0xff] }
  0x29   :  { %709 = vmatpush3.bf16.msra.mxu0 %v708_v0  ;;  %v147_v30 = vld [vmem:[#allocation3 + $0x170] sm:$0xff]  ;;  %v148_v31 = vld [vmem:[#allocation3 + $0x178] sm:$0xff]  ;;  %v213_v34 = vld [vmem:[#allocation3 + $0x380] sm:$0xff]  ;;  %v720_v36 = vpack.c.bf16 %v116_v27, %v115_v26  ;;  %v754_v38 = vpack.c.bf16 %v182_v33, %v181_v32 }
  0x2a   :  { %741 = vmatpush3.bf16.msra.mxu1 %v740_v1  ;;  %711 = vmatprep.subr.bf16.mxu0 %v710_v4  ;;  %v214_v35 = vld [vmem:[#allocation3 + $0x388] sm:$0xff]  ;;  %v752_v37 = vpack.c.bf16 %v148_v31, %v147_v30  ;;  %v165_v42 = vld [vmem:[#allocation3 + $0x200] sm:$0xff]  ;;  %v183_v49 = vld [vmem:[#allocation3 + $0x290] sm:$0xff] }
  0x2b   :  { %743 = vmatprep.subr.bf16.mxu1 %v742_v5  ;;  %v786_v39 = vpack.c.bf16 %v214_v35, %v213_v34  ;;  %v166_v46 = vld [vmem:[#allocation3 + $0x208] sm:$0xff]  ;;  %v197_v47 = vld [vmem:[#allocation3 + $0x300] sm:$0xff]  ;;  %v184_v50 = vld [vmem:[#allocation3 + $0x298] sm:$0xff] }
  0x2c   :  { %v198_v48 = vld [vmem:[#allocation3 + $0x308] sm:$0xff]  ;;  %v215_v51 = vld [vmem:[#allocation3 + $0x390] sm:$0xff]  ;;  %v216_v52 = vld [vmem:[#allocation3 + $0x398] sm:$0xff]  ;;  %v756_v54 = vpack.c.bf16 %v166_v46, %v165_v42  ;;  %v758_v0 = vpack.c.bf16 %v184_v50, %v183_v49 }
  0x2d   :  { %713 = vmatpush3.bf16.msra.mxu0 %v712_v12  ;;  %v788_v55 = vpack.c.bf16 %v198_v48, %v197_v47  ;;  %v167_v58 = vld [vmem:[#allocation3 + $0x210] sm:$0xff]  ;;  %v168_v59 = vld [vmem:[#allocation3 + $0x218] sm:$0xff]  ;;  %v185_v62 = vld [vmem:[#allocation3 + $0x2a0] sm:$0xff]  ;;  %v790_v1 = vpack.c.bf16 %v216_v52, %v215_v51 }
  0x2e   :  { %745 = vmatpush3.bf16.msra.mxu1 %v744_v13  ;;  %715 = vmatprep.subr.bf16.mxu0 %v714_v16  ;;  %v199_v60 = vld [vmem:[#allocation3 + $0x310] sm:$0xff]  ;;  %v200_v61 = vld [vmem:[#allocation3 + $0x318] sm:$0xff]  ;;  %v186_v2 = vld [vmem:[#allocation3 + $0x2a8] sm:$0xff]  ;;  %v760_v5 = vpack.c.bf16 %v168_v59, %v167_v58 }
  0x2f   :  { %747 = vmatprep.subr.bf16.mxu1 %v746_v17  ;;  %v217_v3 = vld [vmem:[#allocation3 + $0x3a0] sm:$0xff]  ;;  %v218_v4 = vld [vmem:[#allocation3 + $0x3a8] sm:$0xff]  ;;  %v792_v6 = vpack.c.bf16 %v200_v61, %v199_v60  ;;  %v762_v9 = vpack.c.bf16 %v186_v2, %v185_v62  ;;  %v187_v13 = vld [vmem:[#allocation3 + $0x2b0] sm:$0xff] }
  0x30   :  { %v169_v7 = vld [vmem:[#allocation3 + $0x220] sm:$0xff]  ;;  %v170_v8 = vld [vmem:[#allocation3 + $0x228] sm:$0xff]  ;;  %v794_v10 = vpack.c.bf16 %v218_v4, %v217_v3  ;;  %v188_v14 = vld [vmem:[#allocation3 + $0x2b8] sm:$0xff] }
  0x31   :  { %717 = vmatpush3.bf16.msra.mxu0 %v716_v24  ;;  %v201_v11 = vld [vmem:[#allocation3 + $0x320] sm:$0xff]  ;;  %v202_v12 = vld [vmem:[#allocation3 + $0x328] sm:$0xff]  ;;  %v219_v15 = vld [vmem:[#allocation3 + $0x3b0] sm:$0xff]  ;;  %v764_v17 = vpack.c.bf16 %v170_v8, %v169_v7  ;;  %v766_v21 = vpack.c.bf16 %v188_v14, %v187_v13  ;;  %v53_v14 = vadd.s32 512, %v909_v41 }
  0x32   :  { %749 = vmatpush3.bf16.msra.mxu1 %v748_v25  ;;  %719 = vmatprep.subr.bf16.mxu0 %v718_v28  ;;  %v220_v16 = vld [vmem:[#allocation3 + $0x3b8] sm:$0xff]  ;;  %v796_v18 = vpack.c.bf16 %v202_v12, %v201_v11  ;;  %v171_v19 = vld [vmem:[#allocation3 + $0x230] sm:$0xff]  ;;  %v189_v25 = vld [vmem:[#allocation3 + $0x2c0] sm:$0xff] }
  0x33   :  { %751 = vmatprep.subr.bf16.mxu1 %v750_v29  ;;  %v172_v20 = vld [vmem:[#allocation3 + $0x238] sm:$0xff]  ;;  %v798_v22 = vpack.c.bf16 %v220_v16, %v219_v15  ;;  %v203_v23 = vld [vmem:[#allocation3 + $0x330] sm:$0xff]  ;;  %v190_v26 = vld [vmem:[#allocation3 + $0x2c8] sm:$0xff]  ;;  %v55_v15 = vadd.s32 768, %v909_v41 }
  0x34   :  { %v204_v24 = vld [vmem:[#allocation3 + $0x338] sm:$0xff]  ;;  %v221_v27 = vld [vmem:[#allocation3 + $0x3c0] sm:$0xff]  ;;  %v222_v28 = vld [vmem:[#allocation3 + $0x3c8] sm:$0xff]  ;;  %v768_v29 = vpack.c.bf16 %v172_v20, %v171_v19  ;;  %v770_v33 = vpack.c.bf16 %v190_v26, %v189_v25 }
  0x35   :  { %721 = vmatpush3.bf16.msra.mxu0 %v720_v36  ;;  %v800_v30 = vpack.c.bf16 %v204_v24, %v203_v23  ;;  %v173_v31 = vld [vmem:[#allocation3 + $0x240] sm:$0xff]  ;;  %v174_v32 = vld [vmem:[#allocation3 + $0x248] sm:$0xff]  ;;  %v802_v34 = vpack.c.bf16 %v222_v28, %v221_v27  ;;  %v224_v40 = vld [vmem:[#allocation3 + $0x3d8] sm:$0xff] }
  0x36   :  { %753 = vmatpush3.bf16.msra.mxu1 %v752_v37  ;;  %755 = vmatprep.subr.bf16.mxu0 %v754_v38  ;;  %v205_v35 = vld [vmem:[#allocation3 + $0x340] sm:$0xff]  ;;  %v206_v36 = vld [vmem:[#allocation3 + $0x348] sm:$0xff]  ;;  %v191_v37 = vld [vmem:[#allocation3 + $0x2d0] sm:$0xff]  ;;  %v772_v42 = vpack.c.bf16 %v174_v32, %v173_v31 }
  0x37   :  { %787 = vmatprep.subr.bf16.mxu1 %v786_v39  ;;  %v192_v38 = vld [vmem:[#allocation3 + $0x2d8] sm:$0xff]  ;;  %v223_v39 = vld [vmem:[#allocation3 + $0x3d0] sm:$0xff]  ;;  %v193_v50 = vld [vmem:[#allocation3 + $0x2e0] sm:$0xff] }
  0x38   :  { %v774_v46 = vpack.c.bf16 %v192_v38, %v191_v37  ;;  %v806_v47 = vpack.c.bf16 %v224_v40, %v223_v39  ;;  %v207_v48 = vld [vmem:[#allocation3 + $0x350] sm:$0xff]  ;;  %v208_v49 = vld [vmem:[#allocation3 + $0x358] sm:$0xff]  ;;  %v194_v51 = vld [vmem:[#allocation3 + $0x2e8] sm:$0xff] }
  0x39   :  { %v225_v52 = vld [vmem:[#allocation3 + $0x3e0] sm:$0xff]  ;;  %v178_v58 = vld [vmem:[#allocation3 + $0x268] sm:$0xff]  ;;  %v778_v59 = vpack.c.bf16 %v194_v51, %v193_v50  ;;  %v227_v2 = vld [vmem:[#allocation3 + $0x3f0] sm:$0xff] }
  0x3a   :  { %v209_v61 = vld [vmem:[#allocation3 + $0x360] sm:$0xff]  ;;  %v210_v62 = vld [vmem:[#allocation3 + $0x368] sm:$0xff]  ;;  %v228_v3 = vld [vmem:[#allocation3 + $0x3f8] sm:$0xff] }
  0x3b   :  { %v814_v8 = vpack.c.bf16 %v228_v3, %v227_v2  ;;  %v212_v11 = vld [vmem:[#allocation3 + $0x378] sm:$0xff] }
  0x94   :  { %v914_v53 = vpop.permute.xlu0 %75 }
  0x95   :  { %vm78_vm0 = vcmp.eq.s32.totalorder %v914_v53, %v50_v43  ;;  %vm80_vm1 = vcmp.eq.s32.totalorder %v914_v53, %v52_v44  ;;  %vm77_vm2 = vcmp.eq.s32.totalorder %v914_v53, %v909_v41  ;;  %vm79_vm3 = vcmp.eq.s32.totalorder %v914_v53, %v51_v45  ;;  %v175_v44 = vld [vmem:[#allocation3 + $0x250] sm:$0xff]  ;;  %v176_v45 = vld [vmem:[#allocation3 + $0x258] sm:$0xff] }
  0x96   :  { %542 = vmatprep.mubr.msk.f32.mxu0 %vm78_vm0, %v877_v63  ;;  %544 = vmatprep.mubr.msk.f32.mxu1 %vm80_vm1, %v877_v63  ;;  %vm82_vm4 = vcmp.eq.s32.totalorder %v914_v53, %v54_v56  ;;  %vm84_vm5 = vcmp.eq.s32.totalorder %v914_v53, %v56_v57  ;;  %v804_v43 = vpack.c.bf16 %v206_v36, %v205_v35  ;;  %v177_v57 = vld [vmem:[#allocation3 + $0x260] sm:$0xff] }
  0x97   :  { %543 = vmatmul.mubr.msk.f32.vlgmr.msra.gmra.mrb[0].mxu0 %vm77_vm2, %v877_v63  ;;  %545 = vmatmul.mubr.msk.f32.vlgmr.msra.gmra.mrb[0].mxu1 %vm79_vm3, %v877_v63  ;;  %v808_v56 = vpack.c.bf16 %v208_v49, %v207_v48  ;;  %v780_v4 = vpack.c.bf16 %v178_v58, %v177_v57  ;;  %vm81_vm6 = vcmp.eq.s32.totalorder %v914_v53, %v53_v14 }
  0x98   :  { %757 = vmatpush3.bf16.msra.mxu0 %v756_v54  ;;  %789 = vmatpush3.bf16.msra.mxu1 %v788_v55  ;;  %v226_v54 = vld [vmem:[#allocation3 + $0x3e8] sm:$0xff]  ;;  %v776_v55 = vpack.c.bf16 %v176_v45, %v175_v44  ;;  %vm83_vm7 = vcmp.eq.s32.totalorder %v914_v53, %v55_v15 }
  0x99   :  { %546 = vmatprep.mubr.msk.f32.mxu0 %vm82_vm4, %v877_v63  ;;  %548 = vmatprep.mubr.msk.f32.mxu1 %vm84_vm5, %v877_v63  ;;  %v810_v60 = vpack.c.bf16 %v226_v54, %v225_v52 }
  0x9a   :  { %759 = vmatprep.subr.bf16.mxu0 %v758_v0  ;;  %791 = vmatprep.subr.bf16.mxu1 %v790_v1  ;;  %v195_v0 = vld [vmem:[#allocation3 + $0x2f0] sm:$0xff]  ;;  %v196_v1 = vld [vmem:[#allocation3 + $0x2f8] sm:$0xff] }
  0x9b   :  { %v782_v7 = vpack.c.bf16 %v196_v1, %v195_v0 }
  0x9c   :  { %761 = vmatpush3.bf16.msra.mxu0 %v760_v5  ;;  %793 = vmatpush3.bf16.msra.mxu1 %v792_v6  ;;  %v812_v5 = vpack.c.bf16 %v210_v62, %v209_v61  ;;  %v179_v6 = vld [vmem:[#allocation3 + $0x270] sm:$0xff] }
  0x9d   :  { %763 = vmatprep.subr.bf16.mxu0 %v762_v9  ;;  %795 = vmatprep.subr.bf16.mxu1 %v794_v10  ;;  %v180_v9 = vld [vmem:[#allocation3 + $0x278] sm:$0xff]  ;;  %v211_v10 = vld [vmem:[#allocation3 + $0x370] sm:$0xff] }
  0x9e   :  { %v784_v12 = vpack.c.bf16 %v180_v9, %v179_v6  ;;  %v816_v13 = vpack.c.bf16 %v212_v11, %v211_v10 }
  0xa0   :  { %765 = vmatpush3.bf16.msra.mxu0 %v764_v17  ;;  %797 = vmatpush3.bf16.msra.mxu1 %v796_v18 }
  0xa1   :  { %767 = vmatprep.subr.bf16.mxu0 %v766_v21  ;;  %799 = vmatprep.subr.bf16.mxu1 %v798_v22 }
  0xa4   :  { %769 = vmatpush3.bf16.msra.mxu0 %v768_v29  ;;  %801 = vmatpush3.bf16.msra.mxu1 %v800_v30 }
  0xa5   :  { %771 = vmatprep.subr.bf16.mxu0 %v770_v33  ;;  %803 = vmatprep.subr.bf16.mxu1 %v802_v34 }
  0xa8   :  { %773 = vmatpush3.bf16.msra.mxu0 %v772_v42  ;;  %805 = vmatpush3.bf16.msra.mxu1 %v804_v43 }
  0xa9   :  { %775 = vmatprep.subr.bf16.mxu0 %v774_v46  ;;  %807 = vmatprep.subr.bf16.mxu1 %v806_v47 }
  0xac   :  { %777 = vmatpush3.bf16.msra.mxu0 %v776_v55  ;;  %809 = vmatpush3.bf16.msra.mxu1 %v808_v56 }
  0xad   :  { %779 = vmatprep.subr.bf16.mxu0 %v778_v59  ;;  %811 = vmatprep.subr.bf16.mxu1 %v810_v60 }
  0xb0   :  { %781 = vmatpush3.bf16.msra.mxu0 %v780_v4  ;;  %813 = vmatpush3.bf16.msra.mxu1 %v812_v5 }
  0xb1   :  { %783 = vmatprep.subr.bf16.mxu0 %v782_v7  ;;  %815 = vmatprep.subr.bf16.mxu1 %v814_v8 }
  0xb4   :  { %785 = vmatpush3.bf16.msra.mxu0 %v784_v12  ;;  %817 = vmatpush3.bf16.msra.mxu1 %v816_v13 }
  0xb7   :  { %547 = vmatmul.mubr.msk.f32.vlgmr.msra.gmra.mrb[2].mxu0 %vm81_vm6, %v877_v63  ;;  %549 = vmatmul.mubr.msk.f32.vlgmr.msra.gmra.mrb[2].mxu1 %vm83_vm7, %v877_v63 }
 0x16a   :  { %v582_v16 = vpop.f32.mrb[0].mxu0  ;;  %v617_v17 = vpop.f32.mrb[0].mxu1 }
 0x16b   :  { %v583_v18 = vpop.f32.mrb[1].mxu0  ;;  %v618_v19 = vpop.f32.mrb[1].mxu1 }
 0x16c   :  { %v584_v20 = vadd.f32 %v583_v18, %v582_v16  ;;  %v619_v21 = vadd.f32 %v618_v19, %v617_v17 }
 0x16e   :  { %v366_v22 = vadd.f32 %v619_v21, %v584_v20 }
 0x18a   :  { %v652_v23 = vpop.f32.mrb[2].mxu0  ;;  %v687_v24 = vpop.f32.mrb[2].mxu1 }
 0x18b   :  { %v653_v41 = vpop.f32.mrb[3].mxu0  ;;  %v688_v25 = vpop.f32.mrb[3].mxu1 }
 0x18c   :  { %v654_v26 = vadd.f32 %v653_v41, %v652_v23  ;;  %v689_v27 = vadd.f32 %v688_v25, %v687_v24 }
 0x18e   :  { %v436_v53 = vadd.f32 %v654_v26, %v366_v22 }
 0x190   :  { %v506_v28 = vadd.f32 %v689_v27, %v436_v53 }
 0x192   :  { %509 = vst [vmem:[#allocation6] sm:$0xff] %v506_v28 }
 0x193   :  { %858 = shalt.err (!%p855_p12)
}
 0x194   :  { %s859_s28 = scalar_lea.hbm %s951_s2, 128 }
 0x195   :  { %p860_p13 = scmp.ne.s32.totalorder %s951_s2, %s859_s28  ;;  %p863_p0 = scmp.lt.u32.totalorder %s859_s28, %s951_s2 }
 0x197   :  { %p865_p1 = pnand %p863_p0, %p860_p13 }
 0x199   :  { %868 = shalt.err (!%p865_p1)
}
 0x19a   :  { %522 = dma.vmem_to_hbm [thread:$0]  %s520_s1, 128, %s951_s2, [#allocation5]  }
 0x19b   :  { %871 = dma.done.wait [#allocation5], 128  }
 0x19c   :  { %872 = vsyncadd [#allocation5], 4294967168 }
 0x19d   :  { %526 = vsyncpa [#allocation4], 1 }
 0x19e   :  { %527 = vsyncpa [#allocation5], 1 }

</bundles_post_ra>
